<compile_context>
chip_gen: v7x
topology: tpu7x:2x2x1
jax: 0.10.0
libtpu: 0.0.40
codegen_flags: <defaults>
</compile_context>

<pallas_src>
import functools

import jax
import jax.numpy as jnp
import numpy as np
from jax.experimental import pallas as pl
from jax.experimental.pallas import tpu as pltpu

EPS = 1e-5
SLOPE = 0.02


def _resblock_kernel(x_ref, w1_ref, w2_ref, p_ref, o_ref, *, H, C):
    """Whole ResBlock forward in the lane-dense (N*H, W*C) layout.

    x_ref : (N*H, W*C) f32    activation, channels interleaved in lanes (period C)
    w*_ref: (3*W*C, W*C) bf16 conv weight folded into a lane-space matmul
                              (3 H-taps stacked; W-taps + channel mix are the
                               block-tridiagonal structure built host-side)
    p_ref : (8, W*C) f32      packed per-channel BN params, rows:
                              0:g1 1:be1 2:g2 3:be2 4:g3 5:be3 (6,7 pad)
    o_ref : (N*H, W*C) f32    aliased with x's HBM buffer (written last)
    """
    NH, WC = x_ref.shape
    N = NH // H
    W = WC // C
    inv_m = 1.0 / float(N * H * W)

    def batchnorm(v, g, be):
        # Training-mode BN with batch statistics, one-pass (biased) variance.
        # NOTE: E[x^2]-E[x]^2 in f32 is fine at these scales / tolerances;
        # switch to two-pass before tightening tolerances at larger scales.
        s = jnp.concatenate(
            [jnp.sum(v, axis=0, keepdims=True),
             jnp.sum(v * v, axis=0, keepdims=True)], axis=0)        # (2, WC)
        # Fold the W lane-groups so every lane holds its channel's total.
        # Wraparound sum via lane rolls (XLU slot; VPU stays free).
        # Verified for WC == 128 (one vreg of lanes); re-check roll wraparound
        # semantics before scaling to WC > 128.
        sh = C
        while sh < WC:
            s = s + pltpu.roll(s, sh, axis=1)
            sh *= 2
        mean = s[0:1] * inv_m
        var = s[1:2] * inv_m - mean * mean
        scale = g * jax.lax.rsqrt(var + EPS)
        shift = be - mean * scale
        return v * scale + shift

    def leaky_relu(v):
        return jnp.where(v >= 0.0, v, SLOPE * v)

    zero_row = jnp.zeros((N, 1, WC), jnp.float32)

    def conv3x3(v, w_ref):
        # 3x3 / stride 1 / pad 1 conv as ONE lane-dense bf16 MXU matmul:
        # three H-shifted copies (zero rows at image borders handle H padding)
        # are concatenated along lanes; the (3*W*C, W*C) weight already encodes
        # the W taps (with W padding) and the channel mixing.
        # Conv bias intentionally dropped: a constant per-channel shift is
        # erased by the training-mode BN that immediately follows.
        v3 = v.reshape(N, H, WC)
        up = jnp.concatenate([zero_row, v3[:, :H - 1, :]], axis=1)   # v[n, h-1]
        dn = jnp.concatenate([v3[:, 1:, :], zero_row], axis=1)       # v[n, h+1]
        patches = jnp.concatenate([up, v3, dn], axis=2)              # (N, H, 3*WC)
        return jnp.dot(patches.reshape(NH, 3 * WC).astype(jnp.bfloat16),
                       w_ref[...],
                       preferred_element_type=jnp.float32)

    g1, be1 = p_ref[0:1, :], p_ref[1:2, :]
    g2, be2 = p_ref[2:3, :], p_ref[3:4, :]
    g3, be3 = p_ref[4:5, :], p_ref[5:6, :]

    h = leaky_relu(batchnorm(x_ref[...], g1, be1))
    h = conv3x3(h, w1_ref)
    h = leaky_relu(batchnorm(h, g2, be2))
    h = conv3x3(h, w2_ref)
    h = batchnorm(h, g3, be3)
    # Identity bypass: re-read x right before the store (short live range).
    o_ref[...] = (h + x_ref[...]).astype(o_ref.dtype)


# ----------------------------------------------------------------------------
# Host-side (numpy) parameter preparation — done once, not per call.
# ----------------------------------------------------------------------------
def _conv_weight_lanes_np(w_oihw, W):
    """PyTorch (Cout, Cin, 3, 3) conv weight -> (3*W*Cin, W*Cout) lane-space matmul.

    Per H-tap kh, block [wi*Cin+ci, wo*Cout+co] = w[kh, wi-wo+1, ci, co] for
    |wi - wo| <= 1 (block-tridiagonal => W taps + zero W-padding built in).
    """
    w = np.asarray(w_oihw, np.float32)                       # (Cout, Cin, 3, 3)
    w_hwio = np.transpose(w, (2, 3, 1, 0))                   # (3, 3, Cin, Cout)
    blocks = []
    for kh in range(3):
        blk = sum(np.kron(np.eye(W, W, k=-(kw - 1), dtype=np.float32),
                          w_hwio[kh, kw])
                  for kw in range(3))                        # (W*Cin, W*Cout)
        blocks.append(blk)
    return np.concatenate(blocks, axis=0)                    # (3*W*Cin, W*Cout)


def prepare_resblock(params, W):
    """Build device operands once: bf16 lane-space conv weights + packed BN params."""
    C = params["g1"].shape[0]
    assert params["w1"].shape[0] == C and params["w1"].shape[1] == C, \
        "identity bypass requires C_in == C_out"
    assert W & (W - 1) == 0, "W must be a power of two for the lane-roll BN fold"

    w1 = jnp.asarray(_conv_weight_lanes_np(params["w1"], W), jnp.bfloat16)
    w2 = jnp.asarray(_conv_weight_lanes_np(params["w2"], W), jnp.bfloat16)

    # Pack BN affine params into one sublane-aligned (8, W*C) slab.
    # Conv biases b1/b2 are NOT shipped: dead math under training-mode BN.
    rows = [params["g1"], params["be1"],
            params["g2"], params["be2"],
            params["g3"], params["be3"]]
    p = np.zeros((8, W * C), np.float32)
    for i, r in enumerate(rows):
        p[i] = np.tile(np.asarray(r, np.float32).reshape(-1), W)
    return w1, w2, jnp.asarray(p)


@jax.jit
def resblock_pallas(x_nchw, w1, w2, p):
    """x_nchw: (N, C, H, W) f32. w1/w2/p from prepare_resblock."""
    N, C, H, W = x_nchw.shape
    WC = W * C

    x2d = jnp.transpose(x_nchw, (0, 2, 3, 1)).reshape(N * H, WC)   # NCHW -> (N*H, W*C)

    vspec = pl.BlockSpec(memory_space=pltpu.MemorySpace.VMEM)
    kernel = functools.partial(_resblock_kernel, H=H, C=C)

    out2d = pl.pallas_call(
        kernel,
        out_shape=jax.ShapeDtypeStruct((N * H, WC), jnp.float32),
        in_specs=[vspec] * 4,
        out_specs=vspec,
        input_output_aliases={0: 0},   # x2d (read-only, stored last) donates HBM buffer
        compiler_params=pltpu.CompilerParams(vmem_limit_bytes=32 << 20),
    )(x2d, w1, w2, p)

    return jnp.transpose(out2d.reshape(N, H, W, C), (0, 3, 1, 2))   # -> NCHW


# ----------------------------------------------------------------------------
# Pure-JAX reference (NCHW) mirroring the PyTorch forward (keeps conv biases).
# ----------------------------------------------------------------------------
def resblock_reference(x, p):
    def bn(v, g, b):
        mean = v.mean(axis=(0, 2, 3), keepdims=True)
        var = ((v - mean) ** 2).mean(axis=(0, 2, 3), keepdims=True)
        return (v - mean) / jnp.sqrt(var + EPS) * g.reshape(1, -1, 1, 1) \
            + b.reshape(1, -1, 1, 1)

    def conv(v, w, b):
        out = jax.lax.conv_general_dilated(
            v, w, window_strides=(1, 1), padding=[(1, 1), (1, 1)],
            dimension_numbers=("NCHW", "OIHW", "NCHW"))
        return out + b.reshape(1, -1, 1, 1)

    def lrelu(v):
        return jnp.where(v >= 0, v, SLOPE * v)

    h = bn(x, p["g1"], p["be1"]); h = lrelu(h); h = conv(h, p["w1"], p["b1"])
    h = bn(h, p["g2"], p["be2"]); h = lrelu(h); h = conv(h, p["w2"], p["b2"])
    h = bn(h, p["g3"], p["be3"])
    return h + x


def init_params(key, c_in, c_out):
    """Deterministic parameter init matching the shapes in ResBlock.__init__."""
    k1, k2, k3, k4 = jax.random.split(key, 4)
    fan_in = c_in * 9
    fan_out = c_out * 9
    bound1 = float(np.sqrt(6.0 / (fan_in + fan_out)))            # xavier_uniform, gain=1
    bound2 = float(np.sqrt(6.0 / (c_out * 9 + c_out * 9)))
    bbound1 = 1.0 / float(np.sqrt(fan_in))                       # default Conv2d bias init
    bbound2 = 1.0 / float(np.sqrt(c_out * 9))
    return {
        "w1": jax.random.uniform(k1, (c_out, c_in, 3, 3), jnp.float32, -bound1, bound1),
        "b1": jax.random.uniform(k2, (c_out,), jnp.float32, -bbound1, bbound1),
        "w2": jax.random.uniform(k3, (c_out, c_out, 3, 3), jnp.float32, -bound2, bound2),
        "b2": jax.random.uniform(k4, (c_out,), jnp.float32, -bbound2, bbound2),
        # BatchNorm affine params: gamma=1, beta=0 (fresh module)
        "g1": jnp.ones((c_in,), jnp.float32), "be1": jnp.zeros((c_in,), jnp.float32),
        "g2": jnp.ones((c_out,), jnp.float32), "be2": jnp.zeros((c_out,), jnp.float32),
        "g3": jnp.ones((c_out,), jnp.float32), "be3": jnp.zeros((c_out,), jnp.float32),
    }


if __name__ == "__main__":
    # Identity bypass requires in_channels == out_channels; W*C = 128 (lane-dense).
    N, C, H, W = 2, 8, 16, 16
    key = jax.random.PRNGKey(0)
    kx, kp = jax.random.split(key)
    x = jax.random.normal(kx, (N, C, H, W), jnp.float32)
    params = init_params(kp, C, C)

    w1, w2, p = prepare_resblock(params, W)                 # one-time host prep
    out = jax.block_until_ready(resblock_pallas(x, w1, w2, p))
    ref = jax.block_until_ready(resblock_reference(x, params))

    # bf16 MXU operands (f32 accumulation) bound the absolute error to well
    # under 2e-2 at this unit output scale; BN/elementwise math is exact f32.
    np.testing.assert_allclose(np.asarray(out), np.asarray(ref),
                               rtol=1e-2, atol=2e-2)
    print("KERNEL_OK")
</pallas_src>

<mosaic_0001>
module attributes {stable_mosaic.version = 11 : i64} {
  func.func @_resblock_kernel(%arg0: memref<32x128xf32, #tpu.memory_space<vmem>>, %arg1: memref<384x128xbf16, #tpu.memory_space<vmem>>, %arg2: memref<384x128xbf16, #tpu.memory_space<vmem>>, %arg3: memref<8x128xf32, #tpu.memory_space<vmem>>, %arg4: memref<32x128xf32, #tpu.memory_space<vmem>>) attributes {dimension_semantics = [], scalar_prefetch = 0 : i64, scratch_operands = 0 : i64, tpu.core_type = #tpu.core_type<tc>} {
    %cst = arith.constant 0.000000e+00 : f32
    %0 = vector.broadcast %cst : f32 to vector<2x1x128xf32>
    %c0 = arith.constant 0 : index
    %c0_0 = arith.constant 0 : index
    %1 = vector.load %arg3[%c0, %c0_0] : memref<8x128xf32, #tpu.memory_space<vmem>>, vector<1x128xf32>
    %c1 = arith.constant 1 : index
    %c0_1 = arith.constant 0 : index
    %2 = vector.load %arg3[%c1, %c0_1] : memref<8x128xf32, #tpu.memory_space<vmem>>, vector<1x128xf32>
    %c2 = arith.constant 2 : index
    %c0_2 = arith.constant 0 : index
    %3 = vector.load %arg3[%c2, %c0_2] : memref<8x128xf32, #tpu.memory_space<vmem>>, vector<1x128xf32>
    %c3 = arith.constant 3 : index
    %c0_3 = arith.constant 0 : index
    %4 = vector.load %arg3[%c3, %c0_3] : memref<8x128xf32, #tpu.memory_space<vmem>>, vector<1x128xf32>
    %c4 = arith.constant 4 : index
    %c0_4 = arith.constant 0 : index
    %5 = vector.load %arg3[%c4, %c0_4] : memref<8x128xf32, #tpu.memory_space<vmem>>, vector<1x128xf32>
    %c5 = arith.constant 5 : index
    %c0_5 = arith.constant 0 : index
    %6 = vector.load %arg3[%c5, %c0_5] : memref<8x128xf32, #tpu.memory_space<vmem>>, vector<1x128xf32>
    %c0_6 = arith.constant 0 : index
    %c0_7 = arith.constant 0 : index
    %7 = vector.load %arg0[%c0_6, %c0_7] : memref<32x128xf32, #tpu.memory_space<vmem>>, vector<32x128xf32>
    %cst_8 = arith.constant dense<0.000000e+00> : vector<128xf32>
    %8 = vector.multi_reduction <add>, %7, %cst_8 [0] : vector<32x128xf32> to vector<128xf32>
    %9 = vector.shape_cast %8 : vector<128xf32> to vector<1x128xf32>
    %10 = arith.mulf %7, %7 : vector<32x128xf32>
    %cst_9 = arith.constant dense<0.000000e+00> : vector<128xf32>
    %11 = vector.multi_reduction <add>, %10, %cst_9 [0] : vector<32x128xf32> to vector<128xf32>
    %12 = vector.shape_cast %11 : vector<128xf32> to vector<1x128xf32>
    %13 = tpu.concatenate %9, %12 in 0 : vector<1x128xf32>, vector<1x128xf32> -> vector<2x128xf32>
    %c8_i32 = arith.constant 8 : i32
    %14 = tpu.dynamic_rotate %13 by %c8_i32 dim 1 : vector<2x128xf32>, i32 -> vector<2x128xf32>
    %15 = arith.addf %13, %14 : vector<2x128xf32>
    %c16_i32 = arith.constant 16 : i32
    %16 = tpu.dynamic_rotate %15 by %c16_i32 dim 1 : vector<2x128xf32>, i32 -> vector<2x128xf32>
    %17 = arith.addf %15, %16 : vector<2x128xf32>
    %c32_i32 = arith.constant 32 : i32
    %18 = tpu.dynamic_rotate %17 by %c32_i32 dim 1 : vector<2x128xf32>, i32 -> vector<2x128xf32>
    %19 = arith.addf %17, %18 : vector<2x128xf32>
    %c64_i32 = arith.constant 64 : i32
    %20 = tpu.dynamic_rotate %19 by %c64_i32 dim 1 : vector<2x128xf32>, i32 -> vector<2x128xf32>
    %21 = arith.addf %19, %20 : vector<2x128xf32>
    %22 = vector.extract_strided_slice %21 {offsets = [0, 0], sizes = [1, 128], strides = [1, 1]} : vector<2x128xf32> to vector<1x128xf32>
    %cst_10 = arith.constant 0.001953125 : f32
    %23 = vector.broadcast %cst_10 : f32 to vector<1x128xf32>
    %24 = arith.mulf %22, %23 : vector<1x128xf32>
    %25 = vector.extract_strided_slice %21 {offsets = [1, 0], sizes = [1, 128], strides = [1, 1]} : vector<2x128xf32> to vector<1x128xf32>
    %cst_11 = arith.constant 0.001953125 : f32
    %26 = vector.broadcast %cst_11 : f32 to vector<1x128xf32>
    %27 = arith.mulf %25, %26 : vector<1x128xf32>
    %28 = arith.mulf %24, %24 : vector<1x128xf32>
    %29 = arith.subf %27, %28 : vector<1x128xf32>
    %cst_12 = arith.constant 9.99999974E-6 : f32
    %30 = vector.broadcast %cst_12 : f32 to vector<1x128xf32>
    %31 = arith.addf %29, %30 : vector<1x128xf32>
    %32 = math.rsqrt %31 : vector<1x128xf32>
    %33 = arith.mulf %1, %32 : vector<1x128xf32>
    %34 = arith.mulf %24, %33 : vector<1x128xf32>
    %35 = arith.subf %2, %34 : vector<1x128xf32>
    %36 = vector.broadcast %33 : vector<1x128xf32> to vector<32x128xf32>
    %37 = arith.mulf %7, %36 : vector<32x128xf32>
    %38 = vector.broadcast %35 : vector<1x128xf32> to vector<32x128xf32>
    %39 = arith.addf %37, %38 : vector<32x128xf32>
    %cst_13 = arith.constant 0.000000e+00 : f32
    %40 = vector.broadcast %cst_13 : f32 to vector<32x128xf32>
    %41 = arith.cmpf oge, %39, %40 : vector<32x128xf32>
    %cst_14 = arith.constant 2.000000e-02 : f32
    %42 = vector.broadcast %cst_14 : f32 to vector<32x128xf32>
    %43 = arith.mulf %42, %39 : vector<32x128xf32>
    %44 = arith.select %41, %39, %43 : vector<32x128xi1>, vector<32x128xf32>
    %45 = vector.shape_cast %44 : vector<32x128xf32> to vector<2x16x128xf32>
    %46 = vector.extract_strided_slice %45 {offsets = [0, 0, 0], sizes = [2, 15, 128], strides = [1, 1, 1]} : vector<2x16x128xf32> to vector<2x15x128xf32>
    %47 = tpu.concatenate %0, %46 in 1 : vector<2x1x128xf32>, vector<2x15x128xf32> -> vector<2x16x128xf32>
    %48 = vector.extract_strided_slice %45 {offsets = [0, 1, 0], sizes = [2, 15, 128], strides = [1, 1, 1]} : vector<2x16x128xf32> to vector<2x15x128xf32>
    %49 = tpu.concatenate %48, %0 in 1 : vector<2x15x128xf32>, vector<2x1x128xf32> -> vector<2x16x128xf32>
    %50 = tpu.concatenate %47, %45, %49 in 2 : vector<2x16x128xf32>, vector<2x16x128xf32>, vector<2x16x128xf32> -> vector<2x16x384xf32>
    %51 = vector.shape_cast %50 : vector<2x16x384xf32> to vector<32x384xf32>
    %52 = arith.truncf %51 : vector<32x384xf32> to vector<32x384xbf16>
    %c0_15 = arith.constant 0 : index
    %c0_16 = arith.constant 0 : index
    %53 = vector.load %arg1[%c0_15, %c0_16] : memref<384x128xbf16, #tpu.memory_space<vmem>>, vector<384x128xbf16>
    %cst_17 = arith.constant dense<0.000000e+00> : vector<32x128xf32>
    %54 = tpu.matmul %52, %53, %cst_17 {dimension_numbers = #tpu.dot_dimension_numbers<[1], [0], [0], [1], [0, 0, 1, 1], [], []>} : vector<32x384xbf16>, vector<384x128xbf16>, vector<32x128xf32> -> vector<32x128xf32>
    %cst_18 = arith.constant dense<0.000000e+00> : vector<128xf32>
    %55 = vector.multi_reduction <add>, %54, %cst_18 [0] : vector<32x128xf32> to vector<128xf32>
    %56 = vector.shape_cast %55 : vector<128xf32> to vector<1x128xf32>
    %57 = arith.mulf %54, %54 : vector<32x128xf32>
    %cst_19 = arith.constant dense<0.000000e+00> : vector<128xf32>
    %58 = vector.multi_reduction <add>, %57, %cst_19 [0] : vector<32x128xf32> to vector<128xf32>
    %59 = vector.shape_cast %58 : vector<128xf32> to vector<1x128xf32>
    %60 = tpu.concatenate %56, %59 in 0 : vector<1x128xf32>, vector<1x128xf32> -> vector<2x128xf32>
    %c8_i32_20 = arith.constant 8 : i32
    %61 = tpu.dynamic_rotate %60 by %c8_i32_20 dim 1 : vector<2x128xf32>, i32 -> vector<2x128xf32>
    %62 = arith.addf %60, %61 : vector<2x128xf32>
    %c16_i32_21 = arith.constant 16 : i32
    %63 = tpu.dynamic_rotate %62 by %c16_i32_21 dim 1 : vector<2x128xf32>, i32 -> vector<2x128xf32>
    %64 = arith.addf %62, %63 : vector<2x128xf32>
    %c32_i32_22 = arith.constant 32 : i32
    %65 = tpu.dynamic_rotate %64 by %c32_i32_22 dim 1 : vector<2x128xf32>, i32 -> vector<2x128xf32>
    %66 = arith.addf %64, %65 : vector<2x128xf32>
    %c64_i32_23 = arith.constant 64 : i32
    %67 = tpu.dynamic_rotate %66 by %c64_i32_23 dim 1 : vector<2x128xf32>, i32 -> vector<2x128xf32>
    %68 = arith.addf %66, %67 : vector<2x128xf32>
    %69 = vector.extract_strided_slice %68 {offsets = [0, 0], sizes = [1, 128], strides = [1, 1]} : vector<2x128xf32> to vector<1x128xf32>
    %cst_24 = arith.constant 0.001953125 : f32
    %70 = vector.broadcast %cst_24 : f32 to vector<1x128xf32>
    %71 = arith.mulf %69, %70 : vector<1x128xf32>
    %72 = vector.extract_strided_slice %68 {offsets = [1, 0], sizes = [1, 128], strides = [1, 1]} : vector<2x128xf32> to vector<1x128xf32>
    %cst_25 = arith.constant 0.001953125 : f32
    %73 = vector.broadcast %cst_25 : f32 to vector<1x128xf32>
    %74 = arith.mulf %72, %73 : vector<1x128xf32>
    %75 = arith.mulf %71, %71 : vector<1x128xf32>
    %76 = arith.subf %74, %75 : vector<1x128xf32>
    %cst_26 = arith.constant 9.99999974E-6 : f32
    %77 = vector.broadcast %cst_26 : f32 to vector<1x128xf32>
    %78 = arith.addf %76, %77 : vector<1x128xf32>
    %79 = math.rsqrt %78 : vector<1x128xf32>
    %80 = arith.mulf %3, %79 : vector<1x128xf32>
    %81 = arith.mulf %71, %80 : vector<1x128xf32>
    %82 = arith.subf %4, %81 : vector<1x128xf32>
    %83 = vector.broadcast %80 : vector<1x128xf32> to vector<32x128xf32>
    %84 = arith.mulf %54, %83 : vector<32x128xf32>
    %85 = vector.broadcast %82 : vector<1x128xf32> to vector<32x128xf32>
    %86 = arith.addf %84, %85 : vector<32x128xf32>
    %cst_27 = arith.constant 0.000000e+00 : f32
    %87 = vector.broadcast %cst_27 : f32 to vector<32x128xf32>
    %88 = arith.cmpf oge, %86, %87 : vector<32x128xf32>
    %cst_28 = arith.constant 2.000000e-02 : f32
    %89 = vector.broadcast %cst_28 : f32 to vector<32x128xf32>
    %90 = arith.mulf %89, %86 : vector<32x128xf32>
    %91 = arith.select %88, %86, %90 : vector<32x128xi1>, vector<32x128xf32>
    %92 = vector.shape_cast %91 : vector<32x128xf32> to vector<2x16x128xf32>
    %93 = vector.extract_strided_slice %92 {offsets = [0, 0, 0], sizes = [2, 15, 128], strides = [1, 1, 1]} : vector<2x16x128xf32> to vector<2x15x128xf32>
    %94 = tpu.concatenate %0, %93 in 1 : vector<2x1x128xf32>, vector<2x15x128xf32> -> vector<2x16x128xf32>
    %95 = vector.extract_strided_slice %92 {offsets = [0, 1, 0], sizes = [2, 15, 128], strides = [1, 1, 1]} : vector<2x16x128xf32> to vector<2x15x128xf32>
    %96 = tpu.concatenate %95, %0 in 1 : vector<2x15x128xf32>, vector<2x1x128xf32> -> vector<2x16x128xf32>
    %97 = tpu.concatenate %94, %92, %96 in 2 : vector<2x16x128xf32>, vector<2x16x128xf32>, vector<2x16x128xf32> -> vector<2x16x384xf32>
    %98 = vector.shape_cast %97 : vector<2x16x384xf32> to vector<32x384xf32>
    %99 = arith.truncf %98 : vector<32x384xf32> to vector<32x384xbf16>
    %c0_29 = arith.constant 0 : index
    %c0_30 = arith.constant 0 : index
    %100 = vector.load %arg2[%c0_29, %c0_30] : memref<384x128xbf16, #tpu.memory_space<vmem>>, vector<384x128xbf16>
    %cst_31 = arith.constant dense<0.000000e+00> : vector<32x128xf32>
    %101 = tpu.matmul %99, %100, %cst_31 {dimension_numbers = #tpu.dot_dimension_numbers<[1], [0], [0], [1], [0, 0, 1, 1], [], []>} : vector<32x384xbf16>, vector<384x128xbf16>, vector<32x128xf32> -> vector<32x128xf32>
    %cst_32 = arith.constant dense<0.000000e+00> : vector<128xf32>
    %102 = vector.multi_reduction <add>, %101, %cst_32 [0] : vector<32x128xf32> to vector<128xf32>
    %103 = vector.shape_cast %102 : vector<128xf32> to vector<1x128xf32>
    %104 = arith.mulf %101, %101 : vector<32x128xf32>
    %cst_33 = arith.constant dense<0.000000e+00> : vector<128xf32>
    %105 = vector.multi_reduction <add>, %104, %cst_33 [0] : vector<32x128xf32> to vector<128xf32>
    %106 = vector.shape_cast %105 : vector<128xf32> to vector<1x128xf32>
    %107 = tpu.concatenate %103, %106 in 0 : vector<1x128xf32>, vector<1x128xf32> -> vector<2x128xf32>
    %c8_i32_34 = arith.constant 8 : i32
    %108 = tpu.dynamic_rotate %107 by %c8_i32_34 dim 1 : vector<2x128xf32>, i32 -> vector<2x128xf32>
    %109 = arith.addf %107, %108 : vector<2x128xf32>
    %c16_i32_35 = arith.constant 16 : i32
    %110 = tpu.dynamic_rotate %109 by %c16_i32_35 dim 1 : vector<2x128xf32>, i32 -> vector<2x128xf32>
    %111 = arith.addf %109, %110 : vector<2x128xf32>
    %c32_i32_36 = arith.constant 32 : i32
    %112 = tpu.dynamic_rotate %111 by %c32_i32_36 dim 1 : vector<2x128xf32>, i32 -> vector<2x128xf32>
    %113 = arith.addf %111, %112 : vector<2x128xf32>
    %c64_i32_37 = arith.constant 64 : i32
    %114 = tpu.dynamic_rotate %113 by %c64_i32_37 dim 1 : vector<2x128xf32>, i32 -> vector<2x128xf32>
    %115 = arith.addf %113, %114 : vector<2x128xf32>
    %116 = vector.extract_strided_slice %115 {offsets = [0, 0], sizes = [1, 128], strides = [1, 1]} : vector<2x128xf32> to vector<1x128xf32>
    %cst_38 = arith.constant 0.001953125 : f32
    %117 = vector.broadcast %cst_38 : f32 to vector<1x128xf32>
    %118 = arith.mulf %116, %117 : vector<1x128xf32>
    %119 = vector.extract_strided_slice %115 {offsets = [1, 0], sizes = [1, 128], strides = [1, 1]} : vector<2x128xf32> to vector<1x128xf32>
    %cst_39 = arith.constant 0.001953125 : f32
    %120 = vector.broadcast %cst_39 : f32 to vector<1x128xf32>
    %121 = arith.mulf %119, %120 : vector<1x128xf32>
    %122 = arith.mulf %118, %118 : vector<1x128xf32>
    %123 = arith.subf %121, %122 : vector<1x128xf32>
    %cst_40 = arith.constant 9.99999974E-6 : f32
    %124 = vector.broadcast %cst_40 : f32 to vector<1x128xf32>
    %125 = arith.addf %123, %124 : vector<1x128xf32>
    %126 = math.rsqrt %125 : vector<1x128xf32>
    %127 = arith.mulf %5, %126 : vector<1x128xf32>
    %128 = arith.mulf %118, %127 : vector<1x128xf32>
    %129 = arith.subf %6, %128 : vector<1x128xf32>
    %130 = vector.broadcast %127 : vector<1x128xf32> to vector<32x128xf32>
    %131 = arith.mulf %101, %130 : vector<32x128xf32>
    %132 = vector.broadcast %129 : vector<1x128xf32> to vector<32x128xf32>
    %133 = arith.addf %131, %132 : vector<32x128xf32>
    %c0_41 = arith.constant 0 : index
    %c0_42 = arith.constant 0 : index
    %134 = vector.load %arg0[%c0_41, %c0_42] : memref<32x128xf32, #tpu.memory_space<vmem>>, vector<32x128xf32>
    %135 = arith.addf %133, %134 : vector<32x128xf32>
    %c0_43 = arith.constant 0 : index
    %c0_44 = arith.constant 0 : index
    %136 = vector.load %arg4[%c0_43, %c0_44] : memref<32x128xf32, #tpu.memory_space<vmem>>, vector<32x128xf32>
    tpu.vector_store %arg4[%c0_43, %c0_44], %135 {strides = array<i32>} : memref<32x128xf32, #tpu.memory_space<vmem>>, vector<32x128xf32>,
    return
  }
}

</mosaic_0001>

<bundles_post_ra>
// kernel: resblock_pallas.1
= control target key start
LH: loop header
LB: loop body
LE: loop exit
PB: predicated region body
PF: predicated region fallthrough
CT: control target
= control target key end

     0   :  { %vm50_vm0 = vcmask 1040384   ;;  %s1164_s23 = smov 8   ;;  %s1165_s24 = smov 16   ;;  %vm122_vm6 = vcmask 1046528   ;;  %vm1168_vm7 = vmmov 1   ;;  %s1497_s0 = inlined_call_operand.vmem [shape: f32[32,128], index: 0, kind: input, shape index: {}, may-alias: {0,4}]   ;;  %s1498_s1 = inlined_call_operand.vmem [shape: bf16[384,128], index: 1, kind: input, shape index: {}]   ;;  %s1499_s3 = inlined_call_operand.vmem [shape: f32[8,128], index: 3, kind: input, shape index: {}]   ;;  %s1500_s2 = inlined_call_operand.vmem [shape: bf16[384,128], index: 2, kind: input, shape index: {}]   ;;  %s1501_s4 = inlined_call_operand.vmem [shape: f32[32,128], index: 4, kind: output, shape index: {}, may-alias: {0,4}]  }
   0x1   :  { %v1197_v0 = vld [vmem:[%s1497_s0] sm:$0xff]  ;;  %v1202_v1 = vld [vmem:[%s1497_s0 + $0x8] sm:$0xff]  ;;  %v1207_v2 = vld [vmem:[%s1497_s0 + $0x10] sm:$0xff]  ;;  %s1166_s25 = smov 32   ;;  %s1167_s6 = smov 64  }
   0x2   :  { %v1212_v3 = vld [vmem:[%s1497_s0 + $0x18] sm:$0xff]  ;;  %v28_v4 = vadd.f32 %v1202_v1, %v1197_v0  ;;  %v37_v5 = vmul.f32 %v1197_v0, %v1197_v0  ;;  %v38_v6 = vmul.f32 %v1202_v1, %v1202_v1  ;;  %v39_v7 = vmul.f32 %v1207_v2, %v1207_v2  ;;  %v1106_v31 = vld [vmem:[%s1498_s1 + $0x40] sm:$0xff]   ;;  %v1109_v36 = vld [vmem:[%s1498_s1 + $0x48] sm:$0xff]  }
   0x3   :  { %v40_v9 = vmul.f32 %v1212_v3, %v1212_v3  ;;  %v1107_v33 = vld [vmem:[%s1498_s1] sm:$0xff]   ;;  %985 = vmatprep.subr.bf16.mxu0 %v1106_v31  ;;  %v1110_v37 = vld [vmem:[%s1498_s1 + $0x8] sm:$0xff]   ;;  %v1112_v39 = vld [vmem:[%s1498_s1 + $0x50] sm:$0xff]  }
   0x4   :  { %v29_v8 = vadd.f32 %v28_v4, %v1207_v2  ;;  %v41_v10 = vadd.f32 %v38_v6, %v37_v5  ;;  %v1108_v35 = vld [vmem:[%s1498_s1 + $0x80] sm:$0xff]   ;;  %986 = vmatpush3.bf16.msra.mxu0 %v1107_v33  ;;  %v1111_v38 = vld [vmem:[%s1498_s1 + $0x88] sm:$0xff]   ;;  %v1113_v40 = vld [vmem:[%s1498_s1 + $0x10] sm:$0xff]   ;;  %v78_v4 = vlaneseq }
   0x5   :  { %1061 = vmatprep.subr.bf16.mxu1 %v1108_v35  ;;  %987 = vmatprep.subr.bf16.mxu0 %v1109_v36  ;;  %v1114_v41 = vld [vmem:[%s1498_s1 + $0x90] sm:$0xff]   ;;  %v1115_v42 = vld [vmem:[%s1498_s1 + $0x58] sm:$0xff]   ;;  %v1118_v45 = vld [vmem:[%s1498_s1 + $0x60] sm:$0xff]  }
   0x6   :  { %v30_v11 = vadd.f32 %v29_v8, %v1212_v3  ;;  %v42_v12 = vadd.f32 %v41_v10, %v39_v7  ;;  %1062 = vmatpush3.bf16.msra.mxu1 %v1108_v35  ;;  %v1116_v43 = vld [vmem:[%s1498_s1 + $0x18] sm:$0xff]   ;;  %v1119_v46 = vld [vmem:[%s1498_s1 + $0x20] sm:$0xff]   ;;  %v1121_v48 = vld [vmem:[%s1498_s1 + $0x68] sm:$0xff]   ;;  %v79_v5 = vshrl.u32 %v78_v4, 7 }
   0x7   :  { %1063 = vmatprep.subr.bf16.mxu1 %v1111_v38  ;;  %v1117_v44 = vld [vmem:[%s1498_s1 + $0x98] sm:$0xff]   ;;  %v1120_v47 = vld [vmem:[%s1498_s1 + $0xa0] sm:$0xff]   ;;  %v1122_v49 = vld [vmem:[%s1498_s1 + $0x28] sm:$0xff]  }
   0x8   :  { %v31_v13 = vrot.slane %v30_v11, 4  ;;  %v43_v14 = vadd.f32 %v42_v12, %v40_v9  ;;  %988 = vmatpush3.bf16.msra.mxu0 %v1110_v37  ;;  %v1123_v50 = vld [vmem:[%s1498_s1 + $0xa8] sm:$0xff]   ;;  %v1124_v51 = vld [vmem:[%s1498_s1 + $0x70] sm:$0xff]   ;;  %v1127_v54 = vld [vmem:[%s1498_s1 + $0x78] sm:$0xff]   ;;  %v1306_v8 = vsub.s32 0, %v79_v5 }
   0x9   :  { %989 = vmatprep.subr.bf16.mxu0 %v1112_v39  ;;  %v1126_v52 = vld [vmem:[%s1498_s1 + $0xb0] sm:$0xff]   ;;  %v1128_v55 = vld [vmem:[%s1498_s1 + $0x38] sm:$0xff]   ;;  %v18_v7 = vld [vmem:[%s1499_s3] sm:$0x1] }
   0xa   :  { %v32_v15 = vadd.f32 %v31_v13, %v30_v11  ;;  %v44_v16 = vrot.slane %v43_v14, 4  ;;  %1064 = vmatpush3.bf16.msra.mxu1 %v1111_v38  ;;  %v1125_v53 = vld [vmem:[%s1498_s1 + $0x30] sm:$0xff]   ;;  %v1129_v56 = vld [vmem:[%s1498_s1 + $0xb8] sm:$0xff]   ;;  %v19_v11 = vld [vmem:[%s1499_s3 + $0x1] sm:$0x1] }
   0xb   :  { %1065 = vmatprep.subr.bf16.mxu1 %v1114_v41  ;;  %vm933_vm5 = vmneg %vm50_vm0 }
   0xc   :  { %v33_v17 = vrot.slane %v32_v15, 2  ;;  %v45_v18 = vadd.f32 %v44_v16, %v43_v14  ;;  %990 = vmatpush3.bf16.msra.mxu0 %v1113_v40  ;;  %vm1319_vm8 = vmpackc.low %vm1168_vm7, %vm933_vm5 }
   0xd   :  { %991 = vmatprep.subr.bf16.mxu0 %v1115_v42  ;;  %vm1325_vm9 = vmpackc.low %vm122_vm6, %vm1168_vm7 }
   0xe   :  { %v34_v19 = vadd.f32 %v33_v17, %v32_v15  ;;  %v46_v20 = vrot.slane %v45_v18, 2  ;;  %1066 = vmatpush3.bf16.msra.mxu1 %v1114_v41 }
   0xf   :  { %1067 = vmatprep.subr.bf16.mxu1 %v1117_v44 }
  0x10   :  { %v35_v21 = vrot.slane %v34_v19, 1  ;;  %v47_v22 = vadd.f32 %v46_v20, %v45_v18  ;;  %992 = vmatpush3.bf16.msra.mxu0 %v1116_v43 }
  0x11   :  { %993 = vmatprep.subr.bf16.mxu0 %v1118_v45 }
  0x12   :  { %v36_v23 = vadd.f32 %v35_v21, %v34_v19  ;;  %v48_v24 = vrot.slane %v47_v22, 1  ;;  %1068 = vmatpush3.bf16.msra.mxu1 %v1117_v44 }
  0x13   :  { %1069 = vmatprep.subr.bf16.mxu1 %v1120_v47 }
  0x14   :  { %v49_v25 = vadd.f32 %v48_v24, %v47_v22  ;;  %994 = vmatpush3.bf16.msra.mxu0 %v1119_v46 }
  0x15   :  { %995 = vmatprep.subr.bf16.mxu0 %v1121_v48 }
  0x16   :  { %v51_v26 = vsel %vm50_vm0, %v36_v23, %v49_v25  ;;  %1070 = vmatpush3.bf16.msra.mxu1 %v1120_v47 }
  0x17   :  { %52 = vrot.lane.b32.xlu0 %v51_v26, %s1164_s23  ;;  %1071 = vmatprep.subr.bf16.mxu1 %v1123_v50 }
  0x18   :  { %996 = vmatpush3.bf16.msra.mxu0 %v1122_v49 }
  0x19   :  { %997 = vmatprep.subr.bf16.mxu0 %v1124_v51 }
  0x1a   :  { %1072 = vmatpush3.bf16.msra.mxu1 %v1123_v50 }
  0x1b   :  { %1073 = vmatprep.subr.bf16.mxu1 %v1126_v52 }
  0x1c   :  { %998 = vmatpush3.bf16.msra.mxu0 %v1125_v53 }
  0x1d   :  { %999 = vmatprep.subr.bf16.mxu0 %v1127_v54 }
  0x1e   :  { %1074 = vmatpush3.bf16.msra.mxu1 %v1126_v52 }
  0x1f   :  { %1075 = vmatprep.subr.bf16.mxu1 %v1129_v56 }
  0x20   :  { %1000 = vmatpush3.bf16.msra.mxu0 %v1128_v55 }
  0x22   :  { %1076 = vmatpush3.bf16.msra.mxu1 %v1129_v56 }
  0x89   :  { %v53_v27 = vpop.permute.xlu0 %52 }
  0x8a   :  { %v54_v28 = vadd.f32 %v53_v27, %v51_v26 }
  0x8c   :  { %55 = vrot.lane.b32.xlu0 %v54_v28, %s1165_s24 }
  0xfe   :  { %v56_v29 = vpop.permute.xlu0 %55 }
  0xff   :  { %v57_v30 = vadd.f32 %v56_v29, %v54_v28 }
 0x101   :  { %58 = vrot.lane.b32.xlu1 %v57_v30, %s1166_s25 }
 0x173   :  { %v59_v32 = vpop.permute.xlu1 %58 }
 0x174   :  { %v60_v34 = vadd.f32 %v59_v32, %v57_v30 }
 0x176   :  { %61 = vrot.lane.b32.xlu1 %v60_v34, %s1167_s6 }
 0x1e8   :  { %v62_v57 = vpop.permute.xlu1 %61 }
 0x1e9   :  { %v63_v58 = vadd.f32 %v62_v57, %v60_v34 }
 0x1eb   :  { %v64_v59 = vmul.f32 0.001953125, %v63_v58 }
 0x1ed   :  { %v65_v60 = vmul.f32 %v64_v59, %v64_v59 }
 0x1ef   :  { %v67_v61 = vrot.slane %v65_v60, 7 }
 0x1f1   :  { %v69_v62 = vsub.f32 %v64_v59, %v67_v61 }
 0x1f3   :  { %v70_v63 = vadd.f32 1e-05, %v69_v62 }
 0x1f5   :  { %1154 = vrsqrt.f32 %v70_v63 }
 0x1ff   :  { %v1155_v6 = vpop.eup %1154 }
 0x200   :  { %v73_v9 = vrot.slane %v1155_v6, 1 }
 0x202   :  { %v75_v10 = vmul.f32 %v73_v9, %v18_v7 }
 0x204   :  { %v76_v12 = vmul.f32 %v75_v10, %v64_v59  ;;  %v81_v13 = vrot.slane %v75_v10, %v1306_v8 }
 0x206   :  { %v77_v14 = vsub.f32 %v19_v11, %v76_v12  ;;  %v82_v15 = vmul.f32 %v81_v13, %v1197_v0  ;;  %v83_v17 = vmul.f32 %v81_v13, %v1202_v1  ;;  %v84_v18 = vmul.f32 %v81_v13, %v1207_v2 }
 0x207   :  { %v85_v19 = vmul.f32 %v81_v13, %v1212_v3 }
 0x208   :  { %v89_v16 = vrot.slane %v77_v14, %v1306_v8 }
 0x20a   :  { %v90_v20 = vadd.f32 %v89_v16, %v82_v15  ;;  %v91_v21 = vadd.f32 %v89_v16, %v83_v17  ;;  %v92_v22 = vadd.f32 %v89_v16, %v84_v18  ;;  %v93_v23 = vadd.f32 %v89_v16, %v85_v19 }
 0x20c   :  { %vm94_vm1 = vcmp.ge.f32.partialorder %v90_v20, 0.0  ;;  %vm95_vm2 = vcmp.ge.f32.partialorder %v91_v21, 0.0  ;;  %v98_v24 = vmul.f32 0.02, %v90_v20  ;;  %v99_v25 = vmul.f32 0.02, %v91_v21 }
 0x20d   :  { %vm96_vm3 = vcmp.ge.f32.partialorder %v92_v22, 0.0  ;;  %vm97_vm4 = vcmp.ge.f32.partialorder %v93_v23, 0.0  ;;  %v100_v26 = vmul.f32 0.02, %v92_v22  ;;  %v101_v0 = vmul.f32 0.02, %v93_v23 }
 0x20e   :  { %v102_v27 = vsel %vm94_vm1, %v90_v20, %v98_v24  ;;  %v103_v28 = vsel %vm95_vm2, %v91_v21, %v99_v25 }
 0x20f   :  { %v110_v1 = vrot.slane %v102_v27, 7  ;;  %v111_v2 = vrot.slane %v103_v28, 7  ;;  %v123_v3 = vrot.slane %v102_v27, 1  ;;  %v136_v29 = vpack.c.bf16 %v103_v28, %v102_v27 }
 0x210   :  { %v124_v30 = vrot.slane %v103_v28, 1  ;;  %v104_v31 = vsel %vm96_vm3, %v92_v22, %v100_v26  ;;  %v105_v32 = vsel %vm97_vm4, %v93_v23, %v101_v0 }
 0x211   :  { %v112_v33 = vsel %vm50_vm0, %v110_v1, %v111_v2  ;;  %365 = vmatprep.mubr.bf16.mxu0 %v136_v29  ;;  %v126_v35 = vrot.slane %v104_v31, 1  ;;  %v127_v39 = vrot.slane %v105_v32, 1  ;;  %v113_v41 = vrot.slane %v104_v31, 7 }
 0x212   :  { %v935_v36 = vpack.c.bf16 %v112_v33, %v110_v1  ;;  %v125_v37 = vsel %vm122_vm6, %v123_v3, %v124_v30  ;;  %v114_v42 = vrot.slane %v105_v32, 7  ;;  %v139_v43 = vpack.c.bf16 %v105_v32, %v104_v31 }
 0x213   :  { %v942_v40 = vpack.c.bf16 %v124_v30, %v125_v37  ;;  %v128_v44 = vsel %vm122_vm6, %v126_v35, %v127_v39  ;;  %v1130_v35 = vld [vmem:[%s1500_s2 + $0x40] sm:$0xff]  }
 0x214   :  { %936 = vmatmul.mubr.msk.bf16.vlgmr.msra.gmra.mrb[0].mxu0 %vm1319_vm8, %v935_v36  ;;  %v945_v45 = vpack.c.bf16 %v127_v39, %v128_v44  ;;  %v115_v46 = vsel %vm50_vm0, %v113_v41, %v114_v42  ;;  %v1131_v36 = vld [vmem:[%s1500_s2] sm:$0xff]   ;;  %1023 = vmatprep.subr.bf16.mxu0 %v1130_v35  ;;  %v1133_v39 = vld [vmem:[%s1500_s2 + $0x48] sm:$0xff]   ;;  %v1136_v42 = vld [vmem:[%s1500_s2 + $0x50] sm:$0xff]  }
 0x215   :  { %1077 = vmatprep.mubr.msk.bf16.mxu1 %vm1325_vm9, %v942_v40  ;;  %373 = vmatprep.mubr.bf16.mxu0 %v139_v43  ;;  %v939_v47 = vpack.c.bf16 %v115_v46, %v113_v41  ;;  %v1132_v37 = vld [vmem:[%s1500_s2 + $0x80] sm:$0xff]   ;;  %v1134_v40 = vld [vmem:[%s1500_s2 + $0x8] sm:$0xff]   ;;  %v1137_v43 = vld [vmem:[%s1500_s2 + $0x10] sm:$0xff]  }
 0x216   :  { %1078 = vmatmul.mubr.msk.bf16.vlgmr.msra.gmra.mrb[0].mxu1 %vm1325_vm9, %v945_v45  ;;  %1024 = vmatpush3.bf16.msra.mxu0 %v1131_v36  ;;  %v1135_v41 = vld [vmem:[%s1500_s2 + $0x88] sm:$0xff]   ;;  %v1138_v44 = vld [vmem:[%s1500_s2 + $0x90] sm:$0xff]   ;;  %v1139_v45 = vld [vmem:[%s1500_s2 + $0x58] sm:$0xff]  }
 0x217   :  { %1081 = vmatprep.subr.bf16.mxu1 %v1132_v37  ;;  %1025 = vmatprep.subr.bf16.mxu0 %v1133_v39  ;;  %v1140_v46 = vld [vmem:[%s1500_s2 + $0x18] sm:$0xff]  }
 0x218   :  { %1082 = vmatpush3.bf16.msra.mxu1 %v1132_v37 }
 0x219   :  { %1083 = vmatprep.subr.bf16.mxu1 %v1135_v41 }
 0x21a   :  { %1026 = vmatpush3.bf16.msra.mxu0 %v1134_v40 }
 0x21b   :  { %1027 = vmatprep.subr.bf16.mxu0 %v1136_v42 }
 0x21c   :  { %940 = vmatmul.mubr.msk.bf16.gmra.mrb[4].mxu0 %vm1319_vm8, %v939_v47  ;;  %1084 = vmatpush3.bf16.msra.mxu1 %v1135_v41  ;;  %v1141_v47 = vld [vmem:[%s1500_s2 + $0x98] sm:$0xff]  }
 0x21d   :  { %1085 = vmatprep.subr.bf16.mxu1 %v1138_v44 }
 0x21e   :  { %1028 = vmatpush3.bf16.msra.mxu0 %v1137_v43 }
 0x21f   :  { %1029 = vmatprep.subr.bf16.mxu0 %v1139_v45 }
 0x220   :  { %1086 = vmatpush3.bf16.msra.mxu1 %v1138_v44 }
 0x221   :  { %1087 = vmatprep.subr.bf16.mxu1 %v1141_v47 }
 0x222   :  { %1030 = vmatpush3.bf16.msra.mxu0 %v1140_v46 }
 0x224   :  { %1088 = vmatpush3.bf16.msra.mxu1 %v1141_v47 }
 0x2e7   :  { %v1001_v48 = vpop.f32.mrb[0].mxu0 }
 0x2e8   :  { %v1002_v49 = vpop.f32.mrb[1].mxu0 }
 0x2e9   :  { %v1003_v50 = vadd.f32 %v1002_v49, %v1001_v48  ;;  %v1004_v51 = vpop.f32.mrb[2].mxu0  ;;  %v1079_v52 = vpop.f32.mrb[0].mxu1  ;;  %v1142_v48 = vld [vmem:[%s1500_s2 + $0x60] sm:$0xff]  }
 0x2ea   :  { %v1005_v53 = vpop.f32.mrb[3].mxu0  ;;  %v416_v54 = vpop.f32.mrb[1].mxu1  ;;  %v1143_v49 = vld [vmem:[%s1500_s2 + $0x20] sm:$0xff]   ;;  %1031 = vmatprep.subr.bf16.mxu0 %v1142_v48 }
 0x2eb   :  { %v1006_v55 = vadd.f32 %v1005_v53, %v1004_v51  ;;  %v1339_v56 = vadd.f32 %v1003_v50, %v416_v54  ;;  %v1080_v57 = vpop.f32.mrb[2].mxu1  ;;  %v1144_v50 = vld [vmem:[%s1500_s2 + $0xa0] sm:$0xff]   ;;  %1032 = vmatpush3.bf16.msra.mxu0 %v1143_v49  ;;  %v1145_v51 = vld [vmem:[%s1500_s2 + $0x68] sm:$0xff]   ;;  %v1148_v54 = vld [vmem:[%s1500_s2 + $0x70] sm:$0xff]  }
 0x2ec   :  { %v419_v58 = vpop.f32.mrb[3].mxu1  ;;  %1089 = vmatprep.subr.bf16.mxu1 %v1144_v50  ;;  %v1147_v53 = vld [vmem:[%s1500_s2 + $0xa8] sm:$0xff]   ;;  %1033 = vmatprep.subr.bf16.mxu0 %v1145_v51 }
 0x2ed   :  { %v1341_v59 = vadd.f32 %v1006_v55, %v419_v58  ;;  %v440_v6 = vmul.f32 %v1339_v56, %v1339_v56  ;;  %1090 = vmatpush3.bf16.msra.mxu1 %v1144_v50  ;;  %v1150_v55 = vld [vmem:[%s1500_s2 + $0xb0] sm:$0xff]   ;;  %v1151_v58 = vld [vmem:[%s1500_s2 + $0x78] sm:$0xff]  }
 0x2ee   :  { %1091 = vmatprep.subr.bf16.mxu1 %v1147_v53 }
 0x2ef   :  { %v1007_v60 = vpop.f32.mrb[4].mxu0  ;;  %v441_v62 = vmul.f32 %v1341_v59, %v1341_v59  ;;  %v431_v7 = vadd.f32 %v1341_v59, %v1339_v56 }
 0x2f0   :  { %v1008_v61 = vpop.f32.mrb[5].mxu0 }
 0x2f1   :  { %v1009_v63 = vadd.f32 %v1008_v61, %v1007_v60  ;;  %v1010_v4 = vpop.f32.mrb[6].mxu0  ;;  %v444_v11 = vadd.f32 %v441_v62, %v440_v6  ;;  %1092 = vmatpush3.bf16.msra.mxu1 %v1147_v53  ;;  %v1152_v60 = vld [vmem:[%s1500_s2 + $0x38] sm:$0xff]  }
 0x2f2   :  { %v1011_v5 = vpop.f32.mrb[7].mxu0  ;;  %1093 = vmatprep.subr.bf16.mxu1 %v1150_v55  ;;  %v1153_v61 = vld [vmem:[%s1500_s2 + $0xb8] sm:$0xff]  }
 0x2f3   :  { %v1349_v9 = vadd.f32 %v1079_v52, %v1009_v63  ;;  %v1012_v10 = vadd.f32 %v1011_v5, %v1010_v4  ;;  %v1146_v52 = vld [vmem:[%s1500_s2 + $0x28] sm:$0xff]  }
 0x2f4   :  { %1034 = vmatpush3.bf16.msra.mxu0 %v1146_v52 }
 0x2f5   :  { %v432_v12 = vadd.f32 %v431_v7, %v1349_v9  ;;  %v442_v13 = vmul.f32 %v1349_v9, %v1349_v9  ;;  %v1354_v14 = vadd.f32 %v1080_v57, %v1012_v10  ;;  %v1149_v57 = vld [vmem:[%s1500_s2 + $0x30] sm:$0xff]   ;;  %1035 = vmatprep.subr.bf16.mxu0 %v1148_v54  ;;  %1094 = vmatpush3.bf16.msra.mxu1 %v1150_v55 }
 0x2f6   :  { %1095 = vmatprep.subr.bf16.mxu1 %v1153_v61 }
 0x2f7   :  { %v445_v15 = vadd.f32 %v444_v11, %v442_v13  ;;  %v433_v16 = vadd.f32 %v432_v12, %v1354_v14  ;;  %v443_v17 = vmul.f32 %v1354_v14, %v1354_v14  ;;  %v20_v12 = vld [vmem:[%s1499_s3 + $0x2] sm:$0x1] }
 0x2f8   :  { %1036 = vmatpush3.bf16.msra.mxu0 %v1149_v57 }
 0x2f9   :  { %v434_v18 = vrot.slane %v433_v16, 4  ;;  %v446_v19 = vadd.f32 %v445_v15, %v443_v17  ;;  %1037 = vmatprep.subr.bf16.mxu0 %v1151_v58  ;;  %1096 = vmatpush3.bf16.msra.mxu1 %v1153_v61 }
 0x2fb   :  { %v435_v20 = vadd.f32 %v434_v18, %v433_v16  ;;  %v447_v21 = vrot.slane %v446_v19, 4  ;;  %v21_v16 = vld [vmem:[%s1499_s3 + $0x3] sm:$0x1] }
 0x2fc   :  { %1038 = vmatpush3.bf16.msra.mxu0 %v1152_v60 }
 0x2fd   :  { %v436_v22 = vrot.slane %v435_v20, 2  ;;  %v448_v23 = vadd.f32 %v447_v21, %v446_v19 }
 0x2ff   :  { %v437_v24 = vadd.f32 %v436_v22, %v435_v20  ;;  %v449_v25 = vrot.slane %v448_v23, 2 }
 0x301   :  { %v438_v26 = vrot.slane %v437_v24, 1  ;;  %v450_v0 = vadd.f32 %v449_v25, %v448_v23 }
 0x303   :  { %v451_v27 = vrot.slane %v450_v0, 1  ;;  %v439_v28 = vadd.f32 %v438_v26, %v437_v24 }
 0x305   :  { %v452_v1 = vadd.f32 %v451_v27, %v450_v0 }
 0x307   :  { %v453_v2 = vsel %vm50_vm0, %v439_v28, %v452_v1 }
 0x308   :  { %454 = vrot.lane.b32.xlu0 %v453_v2, %s1164_s23 }
 0x37a   :  { %v455_v3 = vpop.permute.xlu0 %454 }
 0x37b   :  { %v456_v29 = vadd.f32 %v455_v3, %v453_v2 }
 0x37d   :  { %457 = vrot.lane.b32.xlu1 %v456_v29, %s1165_s24 }
 0x3ef   :  { %v458_v30 = vpop.permute.xlu1 %457 }
 0x3f0   :  { %v459_v31 = vadd.f32 %v458_v30, %v456_v29 }
 0x3f2   :  { %460 = vrot.lane.b32.xlu0 %v459_v31, %s1166_s25 }
 0x464   :  { %v461_v32 = vpop.permute.xlu0 %460 }
 0x465   :  { %v462_v33 = vadd.f32 %v461_v32, %v459_v31 }
 0x467   :  { %463 = vrot.lane.b32.xlu1 %v462_v33, %s1167_s6 }
 0x4d9   :  { %v464_v62 = vpop.permute.xlu1 %463 }
 0x4da   :  { %v465_v63 = vadd.f32 %v464_v62, %v462_v33 }
 0x4dc   :  { %v466_v4 = vmul.f32 0.001953125, %v465_v63 }
 0x4de   :  { %v467_v5 = vmul.f32 %v466_v4, %v466_v4 }
 0x4e0   :  { %v469_v6 = vrot.slane %v467_v5, 7 }
 0x4e2   :  { %v471_v7 = vsub.f32 %v466_v4, %v469_v6 }
 0x4e4   :  { %v472_v10 = vadd.f32 1e-05, %v471_v7 }
 0x4e6   :  { %1156 = vrsqrt.f32 %v472_v10 }
 0x4f0   :  { %v1157_v11 = vpop.eup %1156 }
 0x4f1   :  { %v475_v13 = vrot.slane %v1157_v11, 1 }
 0x4f3   :  { %v477_v15 = vmul.f32 %v475_v13, %v20_v12 }
 0x4f5   :  { %v478_v17 = vmul.f32 %v477_v15, %v466_v4  ;;  %v483_v18 = vrot.slane %v477_v15, %v1306_v8 }
 0x4f7   :  { %v479_v19 = vsub.f32 %v21_v16, %v478_v17  ;;  %v484_v20 = vmul.f32 %v483_v18, %v1339_v56  ;;  %v485_v22 = vmul.f32 %v483_v18, %v1341_v59  ;;  %v486_v23 = vmul.f32 %v483_v18, %v1349_v9 }
 0x4f8   :  { %v487_v24 = vmul.f32 %v483_v18, %v1354_v14 }
 0x4f9   :  { %v491_v21 = vrot.slane %v479_v19, %v1306_v8 }
 0x4fb   :  { %v492_v25 = vadd.f32 %v491_v21, %v484_v20  ;;  %v493_v26 = vadd.f32 %v491_v21, %v485_v22  ;;  %v494_v0 = vadd.f32 %v491_v21, %v486_v23  ;;  %v495_v27 = vadd.f32 %v491_v21, %v487_v24 }
 0x4fd   :  { %vm496_vm10 = vcmp.ge.f32.partialorder %v492_v25, 0.0  ;;  %vm497_vm11 = vcmp.ge.f32.partialorder %v493_v26, 0.0  ;;  %v500_v28 = vmul.f32 0.02, %v492_v25  ;;  %v501_v1 = vmul.f32 0.02, %v493_v26 }
 0x4fe   :  { %vm498_vm12 = vcmp.ge.f32.partialorder %v494_v0, 0.0  ;;  %vm499_vm13 = vcmp.ge.f32.partialorder %v495_v27, 0.0  ;;  %v502_v2 = vmul.f32 0.02, %v494_v0  ;;  %v503_v56 = vmul.f32 0.02, %v495_v27 }
 0x4ff   :  { %v504_v3 = vsel %vm496_vm10, %v492_v25, %v500_v28  ;;  %v505_v29 = vsel %vm497_vm11, %v493_v26, %v501_v1 }
 0x500   :  { %v512_v30 = vrot.slane %v504_v3, 7  ;;  %v513_v59 = vrot.slane %v505_v29, 7  ;;  %v524_v31 = vrot.slane %v504_v3, 1  ;;  %v525_v9 = vrot.slane %v505_v29, 1 }
 0x501   :  { %v537_v32 = vpack.c.bf16 %v505_v29, %v504_v3  ;;  %v506_v14 = vsel %vm498_vm12, %v494_v0, %v502_v2  ;;  %v507_v33 = vsel %vm499_vm13, %v495_v27, %v503_v56 }
 0x502   :  { %v514_v35 = vsel %vm50_vm0, %v512_v30, %v513_v59  ;;  %v526_v36 = vsel %vm122_vm6, %v524_v31, %v525_v9  ;;  %v527_v40 = vrot.slane %v506_v14, 1  ;;  %v528_v41 = vrot.slane %v507_v33, 1 }
 0x503   :  { %766 = vmatprep.mubr.bf16.mxu0 %v537_v32  ;;  %v973_v37 = vpack.c.bf16 %v514_v35, %v512_v30  ;;  %v980_v39 = vpack.c.bf16 %v525_v9, %v526_v36  ;;  %v515_v42 = vrot.slane %v506_v14, 7  ;;  %v516_v43 = vrot.slane %v507_v33, 7 }
 0x504   :  { %v540_v44 = vpack.c.bf16 %v507_v33, %v506_v14  ;;  %v529_v45 = vsel %vm122_vm6, %v527_v40, %v528_v41 }
 0x505   :  { %974 = vmatmul.mubr.msk.bf16.vlgmr.msra.gmra.mrb[8].mxu0 %vm1319_vm8, %v973_v37  ;;  %1097 = vmatprep.mubr.msk.bf16.mxu1 %vm1325_vm9, %v980_v39  ;;  %v983_v46 = vpack.c.bf16 %v528_v41, %v529_v45  ;;  %v517_v47 = vsel %vm50_vm0, %v515_v42, %v516_v43  ;;  %v22_v43 = vld [vmem:[%s1499_s3 + $0x4] sm:$0x1] }
 0x506   :  { %774 = vmatprep.mubr.bf16.mxu0 %v540_v44  ;;  %v977_v48 = vpack.c.bf16 %v517_v47, %v515_v42 }
 0x507   :  { %1098 = vmatmul.mubr.msk.bf16.vlgmr.msra.gmra.mrb[4].mxu1 %vm1325_vm9, %v983_v46  ;;  %v23_v46 = vld [vmem:[%s1499_s3 + $0x5] sm:$0x1] }
 0x50d   :  { %978 = vmatmul.mubr.msk.bf16.gmra.mrb[12].mxu0 %vm1319_vm8, %v977_v48 }
 0x5d8   :  { %v1039_v49 = vpop.f32.mrb[8].mxu0 }
 0x5d9   :  { %v1040_v50 = vpop.f32.mrb[9].mxu0 }
 0x5da   :  { %v1041_v51 = vadd.f32 %v1040_v50, %v1039_v49  ;;  %v1042_v52 = vpop.f32.mrb[10].mxu0  ;;  %v1099_v53 = vpop.f32.mrb[4].mxu1 }
 0x5db   :  { %v1043_v54 = vpop.f32.mrb[11].mxu0  ;;  %v817_v55 = vpop.f32.mrb[5].mxu1 }
 0x5dc   :  { %v1044_v57 = vadd.f32 %v1043_v54, %v1042_v52  ;;  %v818_v58 = vadd.f32 %v1041_v51, %v817_v55  ;;  %v1100_v60 = vpop.f32.mrb[6].mxu1 }
 0x5dd   :  { %v820_v61 = vpop.f32.mrb[7].mxu1 }
 0x5de   :  { %v821_v62 = vadd.f32 %v1044_v57, %v820_v61  ;;  %v841_v34 = vmul.f32 %v818_v58, %v818_v58 }
 0x5e0   :  { %v1045_v38 = vpop.f32.mrb[12].mxu0  ;;  %v842_v4 = vmul.f32 %v821_v62, %v821_v62  ;;  %v832_v10 = vadd.f32 %v821_v62, %v818_v58 }
 0x5e1   :  { %v1046_v63 = vpop.f32.mrb[13].mxu0 }
 0x5e2   :  { %v1047_v5 = vadd.f32 %v1046_v63, %v1045_v38  ;;  %v1048_v6 = vpop.f32.mrb[14].mxu0  ;;  %v845_v13 = vadd.f32 %v842_v4, %v841_v34  ;;  %v1160_v38 = vld [vmem:[%s1497_s0] sm:$0xff]  ;;  %v1161_v4 = vld [vmem:[%s1497_s0 + $0x8] sm:$0xff] }
 0x5e3   :  { %v1049_v7 = vpop.f32.mrb[15].mxu0 }
 0x5e4   :  { %v826_v11 = vadd.f32 %v1099_v53, %v1047_v5  ;;  %v1050_v12 = vadd.f32 %v1049_v7, %v1048_v6 }
 0x5e6   :  { %v833_v15 = vadd.f32 %v832_v10, %v826_v11  ;;  %v843_v16 = vmul.f32 %v826_v11, %v826_v11  ;;  %v829_v17 = vadd.f32 %v1100_v60, %v1050_v12 }
 0x5e8   :  { %v846_v18 = vadd.f32 %v845_v13, %v843_v16  ;;  %v834_v19 = vadd.f32 %v833_v15, %v829_v17  ;;  %v844_v20 = vmul.f32 %v829_v17, %v829_v17 }
 0x5ea   :  { %v835_v21 = vrot.slane %v834_v19, 4  ;;  %v847_v22 = vadd.f32 %v846_v18, %v844_v20 }
 0x5ec   :  { %v836_v23 = vadd.f32 %v835_v21, %v834_v19  ;;  %v848_v24 = vrot.slane %v847_v22, 4 }
 0x5ee   :  { %v837_v25 = vrot.slane %v836_v23, 2  ;;  %v849_v26 = vadd.f32 %v848_v24, %v847_v22 }
 0x5f0   :  { %v838_v0 = vadd.f32 %v837_v25, %v836_v23  ;;  %v850_v27 = vrot.slane %v849_v26, 2 }
 0x5f2   :  { %v839_v28 = vrot.slane %v838_v0, 1  ;;  %v851_v1 = vadd.f32 %v850_v27, %v849_v26 }
 0x5f4   :  { %v852_v2 = vrot.slane %v851_v1, 1  ;;  %v840_v56 = vadd.f32 %v839_v28, %v838_v0 }
 0x5f6   :  { %v853_v3 = vadd.f32 %v852_v2, %v851_v1 }
 0x5f8   :  { %v854_v29 = vsel %vm50_vm0, %v840_v56, %v853_v3 }
 0x5f9   :  { %855 = vrot.lane.b32.xlu0 %v854_v29, %s1164_s23 }
 0x66b   :  { %v856_v30 = vpop.permute.xlu0 %855 }
 0x66c   :  { %v857_v59 = vadd.f32 %v856_v30, %v854_v29 }
 0x66e   :  { %858 = vrot.lane.b32.xlu1 %v857_v59, %s1165_s24 }
 0x6e0   :  { %v859_v31 = vpop.permute.xlu1 %858 }
 0x6e1   :  { %v860_v9 = vadd.f32 %v859_v31, %v857_v59 }
 0x6e3   :  { %861 = vrot.lane.b32.xlu0 %v860_v9, %s1166_s25 }
 0x755   :  { %v862_v32 = vpop.permute.xlu0 %861 }
 0x756   :  { %v863_v14 = vadd.f32 %v862_v32, %v860_v9 }
 0x758   :  { %864 = vrot.lane.b32.xlu1 %v863_v14, %s1167_s6 }
 0x7ca   :  { %v865_v33 = vpop.permute.xlu1 %864 }
 0x7cb   :  { %v866_v35 = vadd.f32 %v865_v33, %v863_v14 }
 0x7cd   :  { %v867_v36 = vmul.f32 0.001953125, %v866_v35 }
 0x7cf   :  { %v868_v37 = vmul.f32 %v867_v36, %v867_v36 }
 0x7d1   :  { %v870_v39 = vrot.slane %v868_v37, 7 }
 0x7d3   :  { %v872_v40 = vsub.f32 %v867_v36, %v870_v39 }
 0x7d5   :  { %v873_v41 = vadd.f32 1e-05, %v872_v40 }
 0x7d7   :  { %1158 = vrsqrt.f32 %v873_v41 }
 0x7e1   :  { %v1159_v42 = vpop.eup %1158 }
 0x7e2   :  { %v876_v44 = vrot.slane %v1159_v42, 1 }
 0x7e4   :  { %v878_v45 = vmul.f32 %v876_v44, %v22_v43 }
 0x7e6   :  { %v879_v47 = vmul.f32 %v878_v45, %v867_v36  ;;  %v884_v48 = vrot.slane %v878_v45, %v1306_v8 }
 0x7e8   :  { %v880_v49 = vsub.f32 %v23_v46, %v879_v47  ;;  %v885_v50 = vmul.f32 %v884_v48, %v818_v58  ;;  %v886_v51 = vmul.f32 %v884_v48, %v821_v62  ;;  %v887_v52 = vmul.f32 %v884_v48, %v826_v11  ;;  %v1162_v58 = vld [vmem:[%s1497_s0 + $0x10] sm:$0xff] }
 0x7e9   :  { %v888_v53 = vmul.f32 %v884_v48, %v829_v17 }
 0x7ea   :  { %v892_v54 = vrot.slane %v880_v49, %v1306_v8  ;;  %v1163_v8 = vld [vmem:[%s1497_s0 + $0x18] sm:$0xff] }
 0x7ec   :  { %v893_v55 = vadd.f32 %v892_v54, %v885_v50  ;;  %v894_v57 = vadd.f32 %v892_v54, %v886_v51  ;;  %v895_v60 = vadd.f32 %v892_v54, %v887_v52  ;;  %v896_v61 = vadd.f32 %v892_v54, %v888_v53 }
 0x7ee   :  { %v897_v63 = vadd.f32 %v1160_v38, %v893_v55  ;;  %v898_v5 = vadd.f32 %v1161_v4, %v894_v57  ;;  %v899_v62 = vadd.f32 %v1162_v58, %v895_v60  ;;  %v900_v6 = vadd.f32 %v1163_v8, %v896_v61 }
 0x7f0   :  { %901 = vst [vmem:[%s1501_s4] sm:$0xff] %v897_v63  ;;  %902 = vst [vmem:[%s1501_s4 + $0x8] sm:$0xff] %v898_v5 }
 0x7f1   :  { %903 = vst [vmem:[%s1501_s4 + $0x10] sm:$0xff] %v899_v62  ;;  %904 = vst [vmem:[%s1501_s4 + $0x18] sm:$0xff] %v900_v6 }

</bundles_post_ra>
